<compile_context>
chip_gen: v5e
topology: v5e:2x2
jax: 0.10.0
libtpu: 0.0.40
codegen_flags: <defaults>
</compile_context>

<pallas_src>
import numpy as np
import jax
import jax.numpy as jnp
from jax import lax
from jax.experimental import pallas as pl
from jax.experimental.pallas import tpu as pltpu


_VMEM_LIMIT_BYTES = 56 * 1024 * 1024   # fits v7x (64 MiB phys), > v5e 16 MiB default


def _round_up(x, m):
    return ((x + m - 1) // m) * m


# ---------------------------------------------------------------------------
# Kernel 1: input projection for ALL timesteps, both directions fused.
#   x block: (Tc1, Bp, F) time-major.  w: (F, 6Hp) = [W_ih_fwd | W_ih_bwd]
#   (with b_ih + b_hh[r,z] folded into b).  Outputs: gi_f / gi_b (Tc1,Bp,3Hp).
# ---------------------------------------------------------------------------
def gi_precompute_kernel(x_ref, w_ref, b_ref, gif_ref, gib_ref):
    tc1, bp, f = x_ref.shape
    g3 = gif_ref.shape[-1]                                   # 3*Hp
    x = x_ref[...].reshape(tc1 * bp, f).astype(w_ref.dtype)  # bf16 cast if enabled
    gi = jnp.dot(x, w_ref[...], preferred_element_type=jnp.float32) + b_ref[...]
    gif_ref[...] = gi[:, :g3].reshape(tc1, bp, g3).astype(gif_ref.dtype)
    gib_ref[...] = gi[:, g3:].reshape(tc1, bp, g3).astype(gib_ref.dtype)


# ---------------------------------------------------------------------------
# Kernel 2: fused bidirectional GRU recurrence over time chunks.
#   gi holds x@W_ih + b_ih + b_hh[r,z]  (gate order [r, z, n]).
#   Per step: two dense dots (hf@W_hh_f, hb@W_hh_b), separate hf/hb scratches,
#   time-major sublane-dense output stores.
# ---------------------------------------------------------------------------
def gru_recurrent_kernel(lens_ref, gif_ref, gib_ref, whf_ref, whb_ref,
                         bnf_ref, bnb_ref,
                         outf_ref, outb_ref, hff_ref, hfb_ref,
                         hf_scr, hb_scr):
    c = pl.program_id(0)
    C = pl.num_programs(0)
    Tc, Bp, Hp = outf_ref.shape

    @pl.when(c == 0)
    def _():
        hf_scr[...] = jnp.zeros_like(hf_scr)
        hb_scr[...] = jnp.zeros_like(hb_scr)

    lens = lens_ref[...]                      # (Bp, 1) int32
    whf = whf_ref[...]                        # (Hp, 3Hp)
    whb = whb_ref[...]
    bnf = bnf_ref[...]                        # (1, Hp)  b_hh_n (fwd)
    bnb = bnb_ref[...]
    w_dt = whf.dtype
    t0_f = c * Tc                             # first fwd time of this chunk
    t0_b = (C - 1 - c) * Tc                   # base time of the bwd chunk block

    def step(i, carry):
        hf, hb = carry                        # (Bp, Hp) f32 each
        j = Tc - 1 - i

        gif = gif_ref[i].astype(jnp.float32)  # (Bp, 3Hp) fwd time t0_f + i
        gib = gib_ref[j].astype(jnp.float32)  # (Bp, 3Hp) bwd time t0_b + j

        ghf = jnp.dot(hf.astype(w_dt), whf, preferred_element_type=jnp.float32)
        ghb = jnp.dot(hb.astype(w_dt), whb, preferred_element_type=jnp.float32)

        # forward direction gates
        rz_f = jax.nn.sigmoid(gif[:, :2 * Hp] + ghf[:, :2 * Hp])
        n_f = jnp.tanh(gif[:, 2 * Hp:] + rz_f[:, :Hp] * (ghf[:, 2 * Hp:] + bnf))
        z_f = rz_f[:, Hp:]
        hf_new = (1.0 - z_f) * n_f + z_f * hf

        # backward direction gates
        rz_b = jax.nn.sigmoid(gib[:, :2 * Hp] + ghb[:, :2 * Hp])
        n_b = jnp.tanh(gib[:, 2 * Hp:] + rz_b[:, :Hp] * (ghb[:, 2 * Hp:] + bnb))
        z_b = rz_b[:, Hp:]
        hb_new = (1.0 - z_b) * n_b + z_b * hb

        # packed-sequence semantics: freeze hidden past length, zero outputs
        mf = (t0_f + i) < lens                # (Bp, 1) bool
        mb = (t0_b + j) < lens

        outf_ref[i] = jnp.where(mf, hf_new, 0.0)   # dense (Bp, Hp) store
        outb_ref[j] = jnp.where(mb, hb_new, 0.0)

        return (jnp.where(mf, hf_new, hf), jnp.where(mb, hb_new, hb))

    hf, hb = lax.fori_loop(0, Tc, step, (hf_scr[...], hb_scr[...]),
                           unroll=min(int(Tc), 8))
    hf_scr[...] = hf
    hb_scr[...] = hb
    # write the final-hidden outputs every chunk (cheap insurance; resident
    # accumulator pattern on the "arbitrary" axis)
    hff_ref[...] = hf
    hfb_ref[...] = hb


# ---------------------------------------------------------------------------
# Wrapper
# ---------------------------------------------------------------------------
def _pad_gates(a, H, Hp):
    """Pad each of the 3 GRU gate blocks along the last axis from H to Hp."""
    if Hp == H:
        return a
    pads = [(0, 0)] * (a.ndim - 1) + [(0, Hp - H)]
    return jnp.concatenate(
        [jnp.pad(a[..., g * H:(g + 1) * H], pads) for g in range(3)], axis=-1)


def encoder_rnn_forward(inputs, input_lengths, params, *,
                        time_chunk=64, use_bf16_matmul=False):
    """inputs: (B, T, F) float32 batch-first; input_lengths: (B,) int."""
    inputs = inputs.astype(jnp.float32)
    B, T, F = inputs.shape
    H = params["w_hh_f"].shape[0]

    Bp = _round_up(B, 8)          # sublane-friendly batch
    Hp = _round_up(H, 128)        # lane-tile aligned hidden (per gate)

    w_dtype = jnp.bfloat16 if use_bf16_matmul else jnp.float32
    gi_dtype = jnp.bfloat16 if use_bf16_matmul else jnp.float32
    gi_bytes = 2 if use_bf16_matmul else 4
    w_bytes = 2 if use_bf16_matmul else 4

    # ---- VMEM-budgeted time chunk for the recurrence (fits v7x 64 MiB) ----
    weights_k2 = 2 * Hp * 3 * Hp * w_bytes
    stream_budget = max(4 << 20, (44 << 20) - weights_k2)
    per_t_bytes = Bp * (6 * Hp * gi_bytes + 2 * Hp * 4) * 2   # double-buffered
    Tc = max(1, min(T, int(time_chunk), stream_budget // per_t_bytes))
    C = -(-T // Tc)
    T_pad = C * Tc

    # ---- kernel-1 row blocking decoupled from Tc (output-BW bound) ----
    per_row_bytes = (6 * Hp * gi_bytes + F * 4) * 2
    k1 = 1
    for k in range(1, C + 1):
        if C % k == 0 and (Tc * Bp * k) * per_row_bytes <= (24 << 20):
            k1 = k
    C1 = C // k1
    Tc1 = Tc * k1

    # ---- parameter packing / padding (one-time, tiny) ----
    zHp = jnp.zeros((1, Hp), jnp.float32)

    def pack_dir(wi, wh, bi, bh):
        wi_p = _pad_gates(wi, H, Hp)                                    # (F, 3Hp)
        wh_p = jnp.pad(_pad_gates(wh, H, Hp), ((0, Hp - H), (0, 0)))    # (Hp, 3Hp)
        bi_p = _pad_gates(bi, H, Hp)                                    # (1, 3Hp)
        bh_rz = jnp.concatenate(                                        # r,z of b_hh
            [jnp.pad(bh[:, 0:H], ((0, 0), (0, Hp - H))),
             jnp.pad(bh[:, H:2 * H], ((0, 0), (0, Hp - H))),
             zHp], axis=1)
        b_gi = bi_p + bh_rz                          # folded gi bias (r,z,n)
        b_n = jnp.pad(bh[:, 2 * H:3 * H], ((0, 0), (0, Hp - H)))        # (1, Hp)
        return wi_p, wh_p, b_gi, b_n

    wi_f, wh_f, bgi_f, bn_f = pack_dir(params["w_ih_f"], params["w_hh_f"],
                                       params["b_ih_f"], params["b_hh_f"])
    wi_b, wh_b, bgi_b, bn_b = pack_dir(params["w_ih_b"], params["w_hh_b"],
                                       params["b_ih_b"], params["b_hh_b"])

    w_cat = jnp.concatenate([wi_f, wi_b], axis=1).astype(w_dtype)   # (F, 6Hp)
    b_cat = jnp.concatenate([bgi_f, bgi_b], axis=1)                 # (1, 6Hp) f32
    wh_f = wh_f.astype(w_dtype)
    wh_b = wh_b.astype(w_dtype)

    # ---- input: time-major, pad time / batch ----
    x_tm = jnp.transpose(inputs, (1, 0, 2))                         # (T, B, F)
    x_tm = jnp.pad(x_tm, ((0, T_pad - T), (0, Bp - B), (0, 0)))     # (T_pad, Bp, F)
    lens = jnp.pad(input_lengths.astype(jnp.int32), (0, Bp - B)).reshape(Bp, 1)

    # ---- kernel 1: gi = x @ [W_ih_f|W_ih_b] (+ folded biases), x read once ----
    gi_f, gi_b = pl.pallas_call(
        gi_precompute_kernel,
        out_shape=(jax.ShapeDtypeStruct((T_pad, Bp, 3 * Hp), gi_dtype),
                   jax.ShapeDtypeStruct((T_pad, Bp, 3 * Hp), gi_dtype)),
        grid_spec=pltpu.PrefetchScalarGridSpec(
            num_scalar_prefetch=0,
            grid=(C1,),
            in_specs=[
                pl.BlockSpec((Tc1, Bp, F), lambda c: (c, 0, 0)),
                pl.BlockSpec((F, 6 * Hp), lambda c: (0, 0)),
                pl.BlockSpec((1, 6 * Hp), lambda c: (0, 0)),
            ],
            out_specs=[
                pl.BlockSpec((Tc1, Bp, 3 * Hp), lambda c: (c, 0, 0)),
                pl.BlockSpec((Tc1, Bp, 3 * Hp), lambda c: (c, 0, 0)),
            ],
        ),
        compiler_params=pltpu.CompilerParams(
            dimension_semantics=("parallel",),
            vmem_limit_bytes=_VMEM_LIMIT_BYTES),
    )(x_tm, w_cat, b_cat)

    # ---- kernel 2: fused bidirectional recurrence over time chunks ----
    out_f, out_b, hid_f, hid_b = pl.pallas_call(
        gru_recurrent_kernel,
        out_shape=(jax.ShapeDtypeStruct((T_pad, Bp, Hp), jnp.float32),
                   jax.ShapeDtypeStruct((T_pad, Bp, Hp), jnp.float32),
                   jax.ShapeDtypeStruct((Bp, Hp), jnp.float32),
                   jax.ShapeDtypeStruct((Bp, Hp), jnp.float32)),
        grid_spec=pltpu.PrefetchScalarGridSpec(
            num_scalar_prefetch=0,
            grid=(C,),
            in_specs=[
                pl.BlockSpec((Bp, 1), lambda c: (0, 0)),                   # lens
                pl.BlockSpec((Tc, Bp, 3 * Hp), lambda c: (c, 0, 0)),       # gi fwd
                pl.BlockSpec((Tc, Bp, 3 * Hp), lambda c: (C - 1 - c, 0, 0)),  # gi bwd
                pl.BlockSpec((Hp, 3 * Hp), lambda c: (0, 0)),              # W_hh fwd
                pl.BlockSpec((Hp, 3 * Hp), lambda c: (0, 0)),              # W_hh bwd
                pl.BlockSpec((1, Hp), lambda c: (0, 0)),                   # b_hh_n fwd
                pl.BlockSpec((1, Hp), lambda c: (0, 0)),                   # b_hh_n bwd
            ],
            out_specs=[
                pl.BlockSpec((Tc, Bp, Hp), lambda c: (c, 0, 0)),           # out fwd
                pl.BlockSpec((Tc, Bp, Hp), lambda c: (C - 1 - c, 0, 0)),   # out bwd
                pl.BlockSpec((Bp, Hp), lambda c: (0, 0)),                  # h_f final
                pl.BlockSpec((Bp, Hp), lambda c: (0, 0)),                  # h_b final
            ],
            scratch_shapes=[pltpu.VMEM((Bp, Hp), jnp.float32),
                            pltpu.VMEM((Bp, Hp), jnp.float32)],
        ),
        compiler_params=pltpu.CompilerParams(
            dimension_semantics=("arbitrary",),      # recurrence -> sequential
            vmem_limit_bytes=_VMEM_LIMIT_BYTES),
    )(lens, gi_f, gi_b, wh_f, wh_b, bn_f, bn_b)

    # un-pad + back to batch-first (single fused XLA pass)
    out = jnp.concatenate([out_f[:T, :B, :H], out_b[:T, :B, :H]], axis=-1)
    output = jnp.transpose(out, (1, 0, 2))                    # (B, T, 2H)
    hidden = jnp.concatenate([hid_f[:B, :H], hid_b[:B, :H]], axis=1)
    return output, hidden


# ---------------- pure-JAX reference (for correctness check) ----------------
def _gru_cell(x, h, w_ih, w_hh, b_ih, b_hh, H):
    gi = jnp.dot(x, w_ih, preferred_element_type=jnp.float32) + b_ih
    gh = jnp.dot(h, w_hh, preferred_element_type=jnp.float32) + b_hh
    r = jax.nn.sigmoid(gi[:, 0:H] + gh[:, 0:H])
    z = jax.nn.sigmoid(gi[:, H:2 * H] + gh[:, H:2 * H])
    n = jnp.tanh(gi[:, 2 * H:3 * H] + r * gh[:, 2 * H:3 * H])
    return (1.0 - z) * n + z * h


def reference_forward(inputs, input_lengths, params):
    B, T, F = inputs.shape
    H = params["w_hh_f"].shape[0]
    lens = input_lengths.astype(jnp.int32).reshape(B, 1)

    hf = jnp.zeros((B, H), jnp.float32)
    outf = []
    for t in range(T):
        hn = _gru_cell(inputs[:, t], hf, params["w_ih_f"], params["w_hh_f"],
                       params["b_ih_f"], params["b_hh_f"], H)
        m = (t < lens).astype(jnp.float32)
        hf = m * hn + (1.0 - m) * hf
        outf.append(m * hn)

    hb = jnp.zeros((B, H), jnp.float32)
    outb = [None] * T
    for t in range(T - 1, -1, -1):
        hn = _gru_cell(inputs[:, t], hb, params["w_ih_b"], params["w_hh_b"],
                       params["b_ih_b"], params["b_hh_b"], H)
        m = (t < lens).astype(jnp.float32)
        hb = m * hn + (1.0 - m) * hb
        outb[t] = m * hn

    output = jnp.concatenate([jnp.stack(outf, 1), jnp.stack(outb, 1)], axis=-1)
    hidden = jnp.concatenate([hf, hb], axis=-1)
    return output, hidden


def init_params(key, num_features, hidden_size):
    """Deterministic init matching PyTorch GRU param shapes (stored transposed)."""
    k = 1.0 / np.sqrt(hidden_size)
    keys = jax.random.split(key, 8)
    u = lambda kk, shape: jax.random.uniform(kk, shape, jnp.float32, -k, k)
    return {
        "w_ih_f": u(keys[0], (num_features, 3 * hidden_size)),
        "w_hh_f": u(keys[1], (hidden_size, 3 * hidden_size)),
        "b_ih_f": u(keys[2], (1, 3 * hidden_size)),
        "b_hh_f": u(keys[3], (1, 3 * hidden_size)),
        "w_ih_b": u(keys[4], (num_features, 3 * hidden_size)),
        "w_hh_b": u(keys[5], (hidden_size, 3 * hidden_size)),
        "b_ih_b": u(keys[6], (1, 3 * hidden_size)),
        "b_hh_b": u(keys[7], (1, 3 * hidden_size)),
    }


if __name__ == "__main__":
    B, T, F, H = 2, 8, 20, 32

    key = jax.random.PRNGKey(0)
    k_in, k_par = jax.random.split(key)
    inputs = jax.random.normal(k_in, (B, T, F), jnp.float32)
    input_lengths = jnp.array([8, 5], dtype=jnp.int32)   # sorted descending
    params = init_params(k_par, F, H)

    ref_out, ref_hidden = reference_forward(inputs, input_lengths, params)

    # pad_packed_sequence trims the time axis to max(input_lengths)
    t_max = int(np.max(np.asarray(input_lengths)))
    ref_out_t = ref_out[:, :t_max]

    # ---- f32 MXU path (bit-faithful-ish; tight tolerance) ----
    out, hidden = encoder_rnn_forward(inputs, input_lengths, params,
                                      use_bf16_matmul=False)
    out = jax.block_until_ready(out)
    hidden = jax.block_until_ready(hidden)
    out_t = out[:, :t_max]

    np.testing.assert_allclose(np.asarray(out_t), np.asarray(ref_out_t),
                               rtol=1e-4, atol=1e-4)
    np.testing.assert_allclose(np.asarray(hidden), np.asarray(ref_hidden),
                               rtol=1e-4, atol=1e-4)
    assert out_t.shape == (B, t_max, 2 * H)
    assert hidden.shape == (B, 2 * H)

    # ---- bf16 MXU path (perf option; looser tolerance) ----
    out_b16, hid_b16 = encoder_rnn_forward(inputs, input_lengths, params,
                                           use_bf16_matmul=True)
    out_b16 = jax.block_until_ready(out_b16)
    hid_b16 = jax.block_until_ready(hid_b16)
    np.testing.assert_allclose(np.asarray(out_b16[:, :t_max]),
                               np.asarray(ref_out_t), rtol=3e-2, atol=3e-2)
    np.testing.assert_allclose(np.asarray(hid_b16), np.asarray(ref_hidden),
                               rtol=3e-2, atol=3e-2)

    print("KERNEL_OK")
</pallas_src>

<mosaic_0001>
module attributes {stable_mosaic.version = 11 : i64} {
  func.func @gi_precompute_kernel(%arg0: i32, %arg1: memref<8x8x20xf32, #tpu.memory_space<vmem>>, %arg2: memref<20x768xf32, #tpu.memory_space<vmem>>, %arg3: memref<1x768xf32, #tpu.memory_space<vmem>>, %arg4: memref<8x8x384xf32, #tpu.memory_space<vmem>>, %arg5: memref<8x8x384xf32, #tpu.memory_space<vmem>>) attributes {dimension_semantics = [#tpu.dimension_semantics<parallel>], iteration_bounds = array<i64: 1>, scalar_prefetch = 0 : i64, scratch_operands = 0 : i64, tpu.core_type = #tpu.core_type<tc>, window_params = [{transform_indices = @transform_0, window_bounds = array<i64: 8, 8, 20>}, {pipeline_mode = #tpu.pipeline_mode<synchronous>, transform_indices = @transform_1, window_bounds = array<i64: 20, 768>}, {pipeline_mode = #tpu.pipeline_mode<synchronous>, transform_indices = @transform_2, window_bounds = array<i64: 1, 768>}, {transform_indices = @transform_3, window_bounds = array<i64: 8, 8, 384>}, {transform_indices = @transform_4, window_bounds = array<i64: 8, 8, 384>}]} {
    %c0 = arith.constant 0 : index
    %c0_0 = arith.constant 0 : index
    %c0_1 = arith.constant 0 : index
    %0 = vector.load %arg1[%c0, %c0_0, %c0_1] : memref<8x8x20xf32, #tpu.memory_space<vmem>>, vector<8x8x20xf32>
    %1 = vector.shape_cast %0 : vector<8x8x20xf32> to vector<64x20xf32>
    %c0_2 = arith.constant 0 : index
    %c0_3 = arith.constant 0 : index
    %2 = vector.load %arg2[%c0_2, %c0_3] : memref<20x768xf32, #tpu.memory_space<vmem>>, vector<20x768xf32>
    %cst = arith.constant dense<0.000000e+00> : vector<64x768xf32>
    %3 = tpu.matmul %1, %2, %cst {dimension_numbers = #tpu.dot_dimension_numbers<[1], [0], [0], [1], [0, 0, 1, 1], [], []>} : vector<64x20xf32>, vector<20x768xf32>, vector<64x768xf32> -> vector<64x768xf32>
    %c0_4 = arith.constant 0 : index
    %c0_5 = arith.constant 0 : index
    %4 = vector.load %arg3[%c0_4, %c0_5] : memref<1x768xf32, #tpu.memory_space<vmem>>, vector<1x768xf32>
    %5 = vector.broadcast %4 : vector<1x768xf32> to vector<64x768xf32>
    %6 = arith.addf %3, %5 : vector<64x768xf32>
    %7 = vector.extract_strided_slice %6 {offsets = [0, 0], sizes = [64, 384], strides = [1, 1]} : vector<64x768xf32> to vector<64x384xf32>
    %8 = vector.shape_cast %7 : vector<64x384xf32> to vector<8x8x384xf32>
    %c0_6 = arith.constant 0 : index
    %c0_7 = arith.constant 0 : index
    %c0_8 = arith.constant 0 : index
    %9 = vector.load %arg4[%c0_6, %c0_7, %c0_8] : memref<8x8x384xf32, #tpu.memory_space<vmem>>, vector<8x8x384xf32>
    tpu.vector_store %arg4[%c0_6, %c0_7, %c0_8], %8 {strides = array<i32>} : memref<8x8x384xf32, #tpu.memory_space<vmem>>, vector<8x8x384xf32>,
    %10 = vector.extract_strided_slice %6 {offsets = [0, 384], sizes = [64, 384], strides = [1, 1]} : vector<64x768xf32> to vector<64x384xf32>
    %11 = vector.shape_cast %10 : vector<64x384xf32> to vector<8x8x384xf32>
    %c0_9 = arith.constant 0 : index
    %c0_10 = arith.constant 0 : index
    %c0_11 = arith.constant 0 : index
    %12 = vector.load %arg5[%c0_9, %c0_10, %c0_11] : memref<8x8x384xf32, #tpu.memory_space<vmem>>, vector<8x8x384xf32>
    tpu.vector_store %arg5[%c0_9, %c0_10, %c0_11], %11 {strides = array<i32>} : memref<8x8x384xf32, #tpu.memory_space<vmem>>, vector<8x8x384xf32>,
    return
  }
  func.func @transform_0(%arg0: i32) -> (i32, i32, i32) {
    %c0_i32 = arith.constant 0 : i32
    %c0_i32_0 = arith.constant 0 : i32
    %c0_i32_1 = arith.constant 0 : i32
    return %arg0, %c0_i32, %c0_i32_0 : i32, i32, i32
  }
  func.func @transform_1(%arg0: i32) -> (i32, i32) {
    %c0_i32 = arith.constant 0 : i32
    %c0_i32_0 = arith.constant 0 : i32
    %c0_i32_1 = arith.constant 0 : i32
    return %c0_i32, %c0_i32_0 : i32, i32
  }
  func.func @transform_2(%arg0: i32) -> (i32, i32) {
    %c0_i32 = arith.constant 0 : i32
    %c0_i32_0 = arith.constant 0 : i32
    %c0_i32_1 = arith.constant 0 : i32
    return %c0_i32, %c0_i32_0 : i32, i32
  }
  func.func @transform_3(%arg0: i32) -> (i32, i32, i32) {
    %c0_i32 = arith.constant 0 : i32
    %c0_i32_0 = arith.constant 0 : i32
    %c0_i32_1 = arith.constant 0 : i32
    return %arg0, %c0_i32, %c0_i32_0 : i32, i32, i32
  }
  func.func @transform_4(%arg0: i32) -> (i32, i32, i32) {
    %c0_i32 = arith.constant 0 : i32
    %c0_i32_0 = arith.constant 0 : i32
    %c0_i32_1 = arith.constant 0 : i32
    return %arg0, %c0_i32, %c0_i32_0 : i32, i32, i32
  }
}

</mosaic_0001>

<bundles_post_ra>
// kernel: tpu_custom_call.1
= control target key start
LH: loop header
LB: loop body
LE: loop exit
PB: predicated region body
PF: predicated region fallthrough
CT: control target
= control target key end

     0   :  { %10 = vsyncpa [#allocation3], 0  ;;  %s833_s0 = inlined_call_operand.hbm [shape: f32[8,8,20], index: 0, kind: input, shape index: {}]   ;;  %s834_s1 = inlined_call_operand.hbm [shape: f32[20,768], index: 1, kind: input, shape index: {}]   ;;  %s835_s2 = inlined_call_operand.hbm [shape: f32[1,768], index: 2, kind: input, shape index: {}]   ;;  %s836_s3 = inlined_call_operand.hbm [shape: f32[8,8,384], index: 3, kind: output, shape index: {0}]   ;;  %s837_s4 = inlined_call_operand.hbm [shape: f32[8,8,384], index: 4, kind: output, shape index: {1}]  }
   0x1   :  { %11 = vsyncpa [#allocation6], 0 }
   0x2   :  { %12 = vsyncpa [#allocation4], 0  ;;  %s31_s17 = sshll.u32 %s834_s1, 4  ;;  %s32_s17 = int_to_ptr.hbm [resolvable:$true] %s31_s17 }
   0x3   :  { %13 = vsyncpa [#allocation10], 0  ;;  %s678_s18 = smov [#allocation5]   ;;  %s18_s22 = sshll.u32 %s833_s0, 4  ;;  %s19_s22 = int_to_ptr.hbm [resolvable:$true] %s18_s22 }
   0x4   :  { %s33_s19 = sshll.u32 %s678_s18, 4  ;;  %s679_s23 = smov 768   ;;  %s34_s19 = int_to_ptr.vmem [resolvable:$true] %s33_s19 }
   0x5   :  { %s680_s24 = smov 48   ;;  %s681_s25 = smov [#allocation2]  }
   0x6   :  { %39 = dma.hbm_to_vmem [thread:$0]  %s32_s17, 2304, %s34_s19, [#allocation6], %s679_s23, %s679_s23, %s680_s24  }
   0x7   :  { %s20_s26 = sshll.u32 %s681_s25, 4  ;;  %s682_s27 = smov 128   ;;  %s21_s26 = int_to_ptr.vmem [resolvable:$true] %s20_s26 }
   0x8   :  { %s683_s28 = smov 8   ;;  %s45_s30 = sshll.u32 %s835_s2, 4  ;;  %s46_s30 = int_to_ptr.hbm [resolvable:$true] %s45_s30 }
   0x9   :  { %26 = dma.hbm_to_vmem [thread:$0]  %s19_s22, 1024, %s21_s26, [#allocation3], %s682_s27, %s682_s27, %s683_s28  }
   0xa   :  { %s684_s5 = smov [#allocation7]  }
   0xb   :  { %s47_s6 = sshll.u32 %s684_s5, 4  ;;  %s48_s6 = int_to_ptr.vmem [resolvable:$true] %s47_s6 }
   0xc   :  { %50 = dma.hbm_to_vmem [thread:$0]  %s46_s30, 96, %s48_s6, [#allocation6]  }
   0xd   :  { %670 = dma.done.wait [#allocation3], 1024  }
   0xe   :  { %671 = vsyncadd [#allocation3], 4294966272 }
   0xf   :  { %672 = dma.done.wait [#allocation6], 2400  }
  0x10   :  { %673 = vsyncadd [#allocation6], 4294964896  ;;  %vm128_vm0 = vcmask 1043456   ;;  %v83_v0 = vld [vmem:[#allocation5 + $0x60] sm:$0xf]  ;;  %v77_v2 = vld [vmem:[#allocation5 + $0x30] sm:$0xff] }
  0x11   :  { %v84_v1 = vld [vmem:[#allocation5 + $0x68] sm:$0xf]  ;;  %533 = vmatpush.msk.msra.mxu2 %vm128_vm0, %v83_v0  ;;  %v78_v3 = vld [vmem:[#allocation5 + $0x38] sm:$0xff]  ;;  %v71_v4 = vld [vmem:[#allocation5] sm:$0xff]  ;;  %479 = vmatpush.msk.msra.mxu0 %vm128_vm0, %v83_v0  ;;  %vm103_vm1 = vcmask 162816   ;;  %s685_s0 = smov [#allocation8]  }
  0x12   :  { %536 = vmatpush.msk.msra.mxu3 %vm128_vm0, %v84_v1  ;;  %v72_v5 = vld [vmem:[#allocation5 + $0x8] sm:$0xff]  ;;  %488 = vmatpush.msk.msra.mxu1 %vm128_vm0, %v84_v1  ;;  %v727_v6 = vld [vmem:[#allocation2 + $0x20] sm:$0xff]  ;;  %v85_v7 = vld [vmem:[#allocation5 + $0x70] sm:$0xf]  ;;  %s445_s2 = sshll.u32 %s685_s0, 4  ;;  %s447_s9 = sshll.u32 %s836_s3, 4  ;;  %s446_s2 = int_to_ptr.vmem [resolvable:$true] %s445_s2  ;;  %s448_s9 = int_to_ptr.hbm [resolvable:$true] %s447_s9 }
  0x13   :  { %534 = vmatpush.msra.mxu2 %v77_v2  ;;  %v86_v8 = vld [vmem:[#allocation5 + $0x78] sm:$0xf]  ;;  %161 = vmatpush.msra.mxu0 %v77_v2  ;;  %v63_v9 = vld [vmem:[#allocation2] sm:$0xff]  ;;  %v88_v11 = vld [vmem:[#allocation5 + $0x88] sm:$0xf]  ;;  %s686_s10 = smov [#allocation9]  }
  0x14   :  { %537 = vmatpush.msra.mxu3 %v78_v3  ;;  %202 = vmatpush.msra.mxu1 %v78_v3  ;;  %v87_v10 = vld [vmem:[#allocation5 + $0x80] sm:$0xf]  ;;  %v80_v13 = vld [vmem:[#allocation5 + $0x48] sm:$0xff]  ;;  %v81_v14 = vld [vmem:[#allocation5 + $0x50] sm:$0xff]  ;;  %s458_s11 = sshll.u32 %s686_s10, 4  ;;  %s460_s14 = sshll.u32 %s837_s4, 4  ;;  %s459_s11 = int_to_ptr.vmem [resolvable:$true] %s458_s11  ;;  %s461_s14 = int_to_ptr.hbm [resolvable:$true] %s460_s14 }
  0x15   :  { %535 = vmatpush.msra.mxu2 %v71_v4  ;;  %162 = vmatpush.msra.mxu0 %v71_v4  ;;  %v79_v12 = vld [vmem:[#allocation5 + $0x40] sm:$0xff]  ;;  %v82_v15 = vld [vmem:[#allocation5 + $0x58] sm:$0xff]  ;;  %v73_v16 = vld [vmem:[#allocation5 + $0x10] sm:$0xff]  ;;  %s687_s3 = smov 384   ;;  %s688_s15 = smov 24  }
  0x16   :  { %538 = vmatpush.msra.mxu3 %v72_v5  ;;  %484 = vmatmul.msk.f32.vlgmr.msra.gmra.mxu2 %vm103_vm1, %v727_v6  ;;  %v74_v17 = vld [vmem:[#allocation5 + $0x18] sm:$0xff]  ;;  %v68_v18 = vld [vmem:[#allocation2 + $0x28] sm:$0xff]  ;;  %v75_v19 = vld [vmem:[#allocation5 + $0x20] sm:$0xff] }
  0x17   :  { %493 = vmatmul.msk.f32.vlgmr.msra.gmra.mxu3 %vm103_vm1, %v727_v6  ;;  %497 = vmatpush.msk.msrb.mxu2 %vm128_vm0, %v85_v7  ;;  %v76_v20 = vld [vmem:[#allocation5 + $0x28] sm:$0xff]  ;;  %v69_v22 = vld [vmem:[#allocation2 + $0x30] sm:$0xff]  ;;  %v70_v24 = vld [vmem:[#allocation2 + $0x38] sm:$0xff] }
  0x18   :  { %506 = vmatpush.msk.msrb.mxu3 %vm128_vm0, %v86_v8  ;;  %203 = vmatpush.msra.mxu1 %v72_v5  ;;  %v64_v21 = vld [vmem:[#allocation2 + $0x8] sm:$0xff]  ;;  %v65_v23 = vld [vmem:[#allocation2 + $0x10] sm:$0xff]  ;;  %v66_v25 = vld [vmem:[#allocation2 + $0x18] sm:$0xff] }
  0x19   :  { %480 = vmatmul.msk.f32.vlgmr.msra.gmra.mxu0 %vm103_vm1, %v63_v9  ;;  %489 = vmatmul.msk.f32.vlgmr.msra.gmra.mxu1 %vm103_vm1, %v63_v9  ;;  %v89_v26 = vld [vmem:[#allocation7] sm:$0x3f] }
  0x1a   :  { %515 = vmatpush.msk.msrb.mxu0 %vm128_vm0, %v87_v10  ;;  %524 = vmatpush.msk.msrb.mxu1 %vm128_vm0, %v88_v11  ;;  %v91_v27 = vperm.slane %v89_v26, 0  ;;  %v92_v28 = vperm.slane %v89_v26, 1  ;;  %v787_v61 = vperm.slane %v89_v26, 4  ;;  %v789_v62 = vperm.slane %v89_v26, 5 }
  0x1b   :  { %243 = vmatpush.msrb.mxu2 %v79_v12  ;;  %284 = vmatpush.msrb.mxu3 %v80_v13  ;;  %v791_v63 = vperm.slane %v89_v26, 2  ;;  %v793_v0 = vperm.slane %v89_v26, 3 }
  0x1c   :  { %325 = vmatpush.msrb.mxu0 %v81_v14  ;;  %366 = vmatpush.msrb.mxu1 %v82_v15 }
  0x1d   :  { %244 = vmatpush.msrb.mxu2 %v73_v16  ;;  %285 = vmatpush.msrb.mxu3 %v74_v17 }
  0x1e   :  { %485 = vmatmul.msk.f32.gmra.mxu2 %vm103_vm1, %v68_v18  ;;  %326 = vmatpush.msrb.mxu0 %v75_v19 }
  0x1f   :  { %494 = vmatmul.msk.f32.gmra.mxu3 %vm103_vm1, %v68_v18  ;;  %367 = vmatpush.msrb.mxu1 %v76_v20 }
  0x21   :  { %481 = vmatmul.msk.f32.gmra.mxu0 %vm103_vm1, %v64_v21  ;;  %490 = vmatmul.msk.f32.gmra.mxu1 %vm103_vm1, %v64_v21 }
  0x26   :  { %486 = vmatmul.msk.f32.gmra.mxu2 %vm103_vm1, %v69_v22 }
  0x27   :  { %495 = vmatmul.msk.f32.gmra.mxu3 %vm103_vm1, %v69_v22 }
  0x29   :  { %482 = vmatmul.msk.f32.gmra.mxu0 %vm103_vm1, %v65_v23  ;;  %491 = vmatmul.msk.f32.gmra.mxu1 %vm103_vm1, %v65_v23 }
  0x2e   :  { %487 = vmatmul.msk.f32.gmra.mxu2 %vm103_vm1, %v70_v24 }
  0x2f   :  { %496 = vmatmul.msk.f32.gmra.mxu3 %vm103_vm1, %v70_v24 }
  0x31   :  { %483 = vmatmul.msk.f32.gmra.mxu0 %vm103_vm1, %v66_v25  ;;  %492 = vmatmul.msk.f32.gmra.mxu1 %vm103_vm1, %v66_v25 }
  0x36   :  { %498 = vmatmul.msk.f32.vlgmr.msrb.gmra.mxu2 %vm103_vm1, %v63_v9 }
  0x37   :  { %507 = vmatmul.msk.f32.vlgmr.msrb.gmra.mxu3 %vm103_vm1, %v63_v9 }
  0x39   :  { %516 = vmatmul.msk.f32.vlgmr.msrb.gmra.mxu0 %vm103_vm1, %v63_v9  ;;  %525 = vmatmul.msk.f32.vlgmr.msrb.gmra.mxu1 %vm103_vm1, %v63_v9 }
  0x3e   :  { %499 = vmatmul.msk.f32.gmra.mxu2 %vm103_vm1, %v64_v21 }
  0x3f   :  { %508 = vmatmul.msk.f32.gmra.mxu3 %vm103_vm1, %v64_v21 }
  0x41   :  { %517 = vmatmul.msk.f32.gmra.mxu0 %vm103_vm1, %v64_v21  ;;  %526 = vmatmul.msk.f32.gmra.mxu1 %vm103_vm1, %v64_v21 }
  0x46   :  { %500 = vmatmul.msk.f32.gmra.mxu2 %vm103_vm1, %v65_v23 }
  0x47   :  { %509 = vmatmul.msk.f32.gmra.mxu3 %vm103_vm1, %v65_v23 }
  0x49   :  { %518 = vmatmul.msk.f32.gmra.mxu0 %vm103_vm1, %v65_v23  ;;  %527 = vmatmul.msk.f32.gmra.mxu1 %vm103_vm1, %v65_v23 }
  0x4e   :  { %501 = vmatmul.msk.f32.gmra.mxu2 %vm103_vm1, %v66_v25 }
  0x4f   :  { %510 = vmatmul.msk.f32.gmra.mxu3 %vm103_vm1, %v66_v25 }
  0x51   :  { %519 = vmatmul.msk.f32.gmra.mxu0 %vm103_vm1, %v66_v25  ;;  %528 = vmatmul.msk.f32.gmra.mxu1 %vm103_vm1, %v66_v25 }
  0x56   :  { %502 = vmatmul.msk.f32.gmra.mxu2 %vm103_vm1, %v727_v6 }
  0x57   :  { %511 = vmatmul.msk.f32.gmra.mxu3 %vm103_vm1, %v727_v6 }
  0x59   :  { %520 = vmatmul.msk.f32.gmra.mxu0 %vm103_vm1, %v727_v6  ;;  %529 = vmatmul.msk.f32.gmra.mxu1 %vm103_vm1, %v727_v6 }
  0x5e   :  { %503 = vmatmul.msk.f32.gmra.mxu2 %vm103_vm1, %v68_v18 }
  0x5f   :  { %512 = vmatmul.msk.f32.gmra.mxu3 %vm103_vm1, %v68_v18 }
  0x61   :  { %521 = vmatmul.msk.f32.gmra.mxu0 %vm103_vm1, %v68_v18  ;;  %530 = vmatmul.msk.f32.gmra.mxu1 %vm103_vm1, %v68_v18 }
  0x66   :  { %504 = vmatmul.msk.f32.gmra.mxu2 %vm103_vm1, %v69_v22 }
  0x67   :  { %513 = vmatmul.msk.f32.gmra.mxu3 %vm103_vm1, %v69_v22 }
  0x69   :  { %522 = vmatmul.msk.f32.gmra.mxu0 %vm103_vm1, %v69_v22  ;;  %531 = vmatmul.msk.f32.gmra.mxu1 %vm103_vm1, %v69_v22 }
  0x6e   :  { %505 = vmatmul.msk.f32.gmra.mxu2 %vm103_vm1, %v70_v24 }
  0x6f   :  { %514 = vmatmul.msk.f32.gmra.mxu3 %vm103_vm1, %v70_v24 }
  0x71   :  { %523 = vmatmul.msk.f32.gmra.mxu0 %vm103_vm1, %v70_v24  ;;  %532 = vmatmul.msk.f32.gmra.mxu1 %vm103_vm1, %v70_v24 }
  0x96   :  { %v164_v29 = vpop.f32.mrf.mxu0  ;;  %v205_v30 = vpop.f32.mrf.mxu1 }
  0x97   :  { %v165_v31 = vadd.f32 %v164_v29, %v91_v27  ;;  %v206_v32 = vadd.f32 %v205_v30, %v92_v28 }
  0x99   :  { %393 = vst [vmem:[#allocation8] sm:$0xff] %v165_v31  ;;  %v176_v33 = vpop.f32.mrf.mxu2 }
  0x9a   :  { %v217_v34 = vpop.f32.mrf.mxu3  ;;  %v177_v35 = vadd.f32 %v176_v33, %v91_v27  ;;  %394 = vst [vmem:[#allocation8 + $0x8] sm:$0xff] %v206_v32 }
  0x9b   :  { %v218_v36 = vadd.f32 %v217_v34, %v92_v28 }
  0x9c   :  { %405 = vst [vmem:[#allocation8 + $0x60] sm:$0xff] %v177_v35 }
  0x9d   :  { %406 = vst [vmem:[#allocation8 + $0x68] sm:$0xff] %v218_v36 }
  0x9e   :  { %v167_v37 = vpop.f32.mrf.mxu0  ;;  %v208_v38 = vpop.f32.mrf.mxu1 }
  0x9f   :  { %v168_v39 = vadd.f32 %v167_v37, %v91_v27  ;;  %v209_v40 = vadd.f32 %v208_v38, %v92_v28 }
  0xa1   :  { %396 = vst [vmem:[#allocation8 + $0x18] sm:$0xff] %v168_v39  ;;  %v179_v41 = vpop.f32.mrf.mxu2 }
  0xa2   :  { %v220_v42 = vpop.f32.mrf.mxu3  ;;  %v180_v43 = vadd.f32 %v179_v41, %v91_v27  ;;  %397 = vst [vmem:[#allocation8 + $0x20] sm:$0xff] %v209_v40 }
  0xa3   :  { %v221_v44 = vadd.f32 %v220_v42, %v92_v28 }
  0xa4   :  { %408 = vst [vmem:[#allocation8 + $0x78] sm:$0xff] %v180_v43 }
  0xa5   :  { %409 = vst [vmem:[#allocation8 + $0x80] sm:$0xff] %v221_v44 }
  0xa6   :  { %v170_v45 = vpop.f32.mrf.mxu0  ;;  %v211_v46 = vpop.f32.mrf.mxu1 }
  0xa7   :  { %v171_v47 = vadd.f32 %v170_v45, %v91_v27  ;;  %v212_v48 = vadd.f32 %v211_v46, %v92_v28 }
  0xa9   :  { %399 = vst [vmem:[#allocation8 + $0x30] sm:$0xff] %v171_v47  ;;  %v182_v49 = vpop.f32.mrf.mxu2 }
  0xaa   :  { %v223_v50 = vpop.f32.mrf.mxu3  ;;  %v183_v51 = vadd.f32 %v182_v49, %v91_v27  ;;  %400 = vst [vmem:[#allocation8 + $0x38] sm:$0xff] %v212_v48 }
  0xab   :  { %v224_v52 = vadd.f32 %v223_v50, %v92_v28 }
  0xac   :  { %411 = vst [vmem:[#allocation8 + $0x90] sm:$0xff] %v183_v51 }
  0xad   :  { %412 = vst [vmem:[#allocation8 + $0x98] sm:$0xff] %v224_v52 }
  0xae   :  { %v173_v53 = vpop.f32.mrf.mxu0  ;;  %v214_v54 = vpop.f32.mrf.mxu1 }
  0xaf   :  { %v174_v55 = vadd.f32 %v173_v53, %v91_v27  ;;  %v215_v56 = vadd.f32 %v214_v54, %v92_v28 }
  0xb1   :  { %402 = vst [vmem:[#allocation8 + $0x48] sm:$0xff] %v174_v55  ;;  %v185_v57 = vpop.f32.mrf.mxu2 }
  0xb2   :  { %v226_v58 = vpop.f32.mrf.mxu3  ;;  %v186_v59 = vadd.f32 %v185_v57, %v91_v27  ;;  %403 = vst [vmem:[#allocation8 + $0x50] sm:$0xff] %v215_v56 }
  0xb3   :  { %v227_v60 = vadd.f32 %v226_v58, %v92_v28 }
  0xb4   :  { %414 = vst [vmem:[#allocation8 + $0xa8] sm:$0xff] %v186_v59 }
  0xb5   :  { %415 = vst [vmem:[#allocation8 + $0xb0] sm:$0xff] %v227_v60 }
  0xb6   :  { %v328_v1 = vpop.f32.mrf.mxu0  ;;  %v369_v2 = vpop.f32.mrf.mxu1 }
  0xb7   :  { %v329_v3 = vadd.f32 %v328_v1, %v787_v61  ;;  %v370_v4 = vadd.f32 %v369_v2, %v789_v62 }
  0xb9   :  { %v246_v5 = vpop.f32.mrf.mxu2  ;;  %418 = vst [vmem:[#allocation9 + $0x8] sm:$0xff] %v329_v3 }
  0xba   :  { %v287_v6 = vpop.f32.mrf.mxu3  ;;  %v247_v7 = vadd.f32 %v246_v5, %v791_v63  ;;  %419 = vst [vmem:[#allocation9 + $0x10] sm:$0xff] %v370_v4 }
  0xbb   :  { %v288_v8 = vadd.f32 %v287_v6, %v793_v0 }
  0xbc   :  { %395 = vst [vmem:[#allocation8 + $0x10] sm:$0xff] %v247_v7 }
  0xbd   :  { %417 = vst [vmem:[#allocation9] sm:$0xff] %v288_v8 }
  0xbe   :  { %v331_v9 = vpop.f32.mrf.mxu0  ;;  %v372_v10 = vpop.f32.mrf.mxu1 }
  0xbf   :  { %v332_v11 = vadd.f32 %v331_v9, %v787_v61  ;;  %v373_v12 = vadd.f32 %v372_v10, %v789_v62 }
  0xc1   :  { %v249_v13 = vpop.f32.mrf.mxu2  ;;  %421 = vst [vmem:[#allocation9 + $0x20] sm:$0xff] %v332_v11 }
  0xc2   :  { %v290_v14 = vpop.f32.mrf.mxu3  ;;  %v250_v15 = vadd.f32 %v249_v13, %v791_v63  ;;  %422 = vst [vmem:[#allocation9 + $0x28] sm:$0xff] %v373_v12 }
  0xc3   :  { %v291_v16 = vadd.f32 %v290_v14, %v793_v0 }
  0xc4   :  { %398 = vst [vmem:[#allocation8 + $0x28] sm:$0xff] %v250_v15 }
  0xc5   :  { %420 = vst [vmem:[#allocation9 + $0x18] sm:$0xff] %v291_v16 }
  0xc6   :  { %v334_v17 = vpop.f32.mrf.mxu0  ;;  %v375_v18 = vpop.f32.mrf.mxu1 }
  0xc7   :  { %v335_v19 = vadd.f32 %v334_v17, %v787_v61  ;;  %v376_v20 = vadd.f32 %v375_v18, %v789_v62 }
  0xc9   :  { %v252_v21 = vpop.f32.mrf.mxu2  ;;  %424 = vst [vmem:[#allocation9 + $0x38] sm:$0xff] %v335_v19 }
  0xca   :  { %v293_v22 = vpop.f32.mrf.mxu3  ;;  %v253_v23 = vadd.f32 %v252_v21, %v791_v63  ;;  %425 = vst [vmem:[#allocation9 + $0x40] sm:$0xff] %v376_v20 }
  0xcb   :  { %v294_v24 = vadd.f32 %v293_v22, %v793_v0 }
  0xcc   :  { %401 = vst [vmem:[#allocation8 + $0x40] sm:$0xff] %v253_v23 }
  0xcd   :  { %423 = vst [vmem:[#allocation9 + $0x30] sm:$0xff] %v294_v24 }
  0xce   :  { %v337_v25 = vpop.f32.mrf.mxu0  ;;  %v378_v26 = vpop.f32.mrf.mxu1 }
  0xcf   :  { %v338_v27 = vadd.f32 %v337_v25, %v787_v61  ;;  %v379_v28 = vadd.f32 %v378_v26, %v789_v62 }
  0xd1   :  { %v255_v29 = vpop.f32.mrf.mxu2  ;;  %427 = vst [vmem:[#allocation9 + $0x50] sm:$0xff] %v338_v27 }
  0xd2   :  { %v296_v30 = vpop.f32.mrf.mxu3  ;;  %v256_v31 = vadd.f32 %v255_v29, %v791_v63  ;;  %428 = vst [vmem:[#allocation9 + $0x58] sm:$0xff] %v379_v28 }
  0xd3   :  { %v297_v32 = vadd.f32 %v296_v30, %v793_v0 }
  0xd4   :  { %404 = vst [vmem:[#allocation8 + $0x58] sm:$0xff] %v256_v31 }
  0xd5   :  { %426 = vst [vmem:[#allocation9 + $0x48] sm:$0xff] %v297_v32 }
  0xd6   :  { %v340_v33 = vpop.f32.mrf.mxu0  ;;  %v381_v34 = vpop.f32.mrf.mxu1 }
  0xd7   :  { %v341_v35 = vadd.f32 %v340_v33, %v787_v61  ;;  %v382_v36 = vadd.f32 %v381_v34, %v789_v62 }
  0xd9   :  { %v258_v37 = vpop.f32.mrf.mxu2  ;;  %430 = vst [vmem:[#allocation9 + $0x68] sm:$0xff] %v341_v35 }
  0xda   :  { %v299_v38 = vpop.f32.mrf.mxu3  ;;  %v259_v39 = vadd.f32 %v258_v37, %v791_v63  ;;  %431 = vst [vmem:[#allocation9 + $0x70] sm:$0xff] %v382_v36 }
  0xdb   :  { %v300_v40 = vadd.f32 %v299_v38, %v793_v0 }
  0xdc   :  { %407 = vst [vmem:[#allocation8 + $0x70] sm:$0xff] %v259_v39 }
  0xdd   :  { %429 = vst [vmem:[#allocation9 + $0x60] sm:$0xff] %v300_v40 }
  0xde   :  { %v343_v41 = vpop.f32.mrf.mxu0  ;;  %v384_v42 = vpop.f32.mrf.mxu1 }
  0xdf   :  { %v344_v43 = vadd.f32 %v343_v41, %v787_v61  ;;  %v385_v44 = vadd.f32 %v384_v42, %v789_v62 }
  0xe1   :  { %v261_v45 = vpop.f32.mrf.mxu2  ;;  %433 = vst [vmem:[#allocation9 + $0x80] sm:$0xff] %v344_v43 }
  0xe2   :  { %v302_v46 = vpop.f32.mrf.mxu3  ;;  %v262_v47 = vadd.f32 %v261_v45, %v791_v63  ;;  %434 = vst [vmem:[#allocation9 + $0x88] sm:$0xff] %v385_v44 }
  0xe3   :  { %v303_v48 = vadd.f32 %v302_v46, %v793_v0 }
  0xe4   :  { %410 = vst [vmem:[#allocation8 + $0x88] sm:$0xff] %v262_v47 }
  0xe5   :  { %432 = vst [vmem:[#allocation9 + $0x78] sm:$0xff] %v303_v48 }
  0xe6   :  { %v346_v49 = vpop.f32.mrf.mxu0  ;;  %v387_v50 = vpop.f32.mrf.mxu1 }
  0xe7   :  { %v347_v51 = vadd.f32 %v346_v49, %v787_v61  ;;  %v388_v52 = vadd.f32 %v387_v50, %v789_v62 }
  0xe9   :  { %v264_v53 = vpop.f32.mrf.mxu2  ;;  %436 = vst [vmem:[#allocation9 + $0x98] sm:$0xff] %v347_v51 }
  0xea   :  { %v305_v54 = vpop.f32.mrf.mxu3  ;;  %v265_v55 = vadd.f32 %v264_v53, %v791_v63  ;;  %437 = vst [vmem:[#allocation9 + $0xa0] sm:$0xff] %v388_v52 }
  0xeb   :  { %v306_v56 = vadd.f32 %v305_v54, %v793_v0 }
  0xec   :  { %413 = vst [vmem:[#allocation8 + $0xa0] sm:$0xff] %v265_v55 }
  0xed   :  { %435 = vst [vmem:[#allocation9 + $0x90] sm:$0xff] %v306_v56 }
  0xee   :  { %v349_v57 = vpop.f32.mrf.mxu0  ;;  %v390_v58 = vpop.f32.mrf.mxu1 }
  0xef   :  { %v350_v59 = vadd.f32 %v349_v57, %v787_v61  ;;  %v391_v60 = vadd.f32 %v390_v58, %v789_v62 }
  0xf1   :  { %v267_v1 = vpop.f32.mrf.mxu2  ;;  %439 = vst [vmem:[#allocation9 + $0xb0] sm:$0xff] %v350_v59 }
  0xf2   :  { %v308_v2 = vpop.f32.mrf.mxu3  ;;  %v268_v3 = vadd.f32 %v267_v1, %v791_v63  ;;  %440 = vst [vmem:[#allocation9 + $0xb8] sm:$0xff] %v391_v60 }
  0xf3   :  { %v309_v4 = vadd.f32 %v308_v2, %v793_v0 }
  0xf4   :  { %416 = vst [vmem:[#allocation8 + $0xb8] sm:$0xff] %v268_v3 }
  0xf5   :  { %438 = vst [vmem:[#allocation9 + $0xa8] sm:$0xff] %v309_v4  ;;  %453 = dma.vmem_to_hbm [thread:$0]  %s446_s2, 3072, %s448_s9, [#allocation4], %s687_s3, %s687_s3, %s688_s15  }
  0xf6   :  { %466 = dma.vmem_to_hbm [thread:$0]  %s459_s11, 3072, %s461_s14, [#allocation10], %s687_s3, %s687_s3, %s688_s15  }
  0xf7   :  { %674 = dma.done.wait [#allocation4], 3072  }
  0xf8   :  { %675 = vsyncadd [#allocation4], 4294964224 }
  0xf9   :  { %676 = dma.done.wait [#allocation10], 3072  }
  0xfa   :  { %677 = vsyncadd [#allocation10], 4294964224 }
  0xfb   :  { %475 = vsyncpa [#allocation3], 1 }
  0xfc   :  { %476 = vsyncpa [#allocation6], 1 }
  0xfd   :  { %477 = vsyncpa [#allocation4], 1 }
  0xfe   :  { %478 = vsyncpa [#allocation10], 1 }

</bundles_post_ra>
